<compile_context>
chip_gen: v5e
topology: v5e:2x2
jax: 0.10.0
libtpu: 0.0.40
codegen_flags: <defaults>
</compile_context>

<pallas_src>
import functools

import jax
import jax.numpy as jnp
from jax import lax
from jax.experimental import pallas as pl
from jax.experimental.pallas import tpu as pltpu

# VMEM bytes we allow one single-pass block's working set to occupy when
# auto-sizing tiles (conservative: v7x has 64 MiB physical VMEM per core).
_VMEM_TILING_BUDGET = 32 << 20


# --------------------------------------------------------------------------- #
# Small host-side helpers
# --------------------------------------------------------------------------- #
def _cdiv(a, b):
    return -(-a // b)


def _round_up(a, m):
    return _cdiv(a, m) * m


def _sublane_rows(itemsize):
    # Sublane packing: 8 rows/vreg for 32-bit dtypes, 16 for 16-bit, 32 for 8-bit.
    return 8 if itemsize >= 4 else (16 if itemsize == 2 else 32)


def _default_block_bytes():
    """Per-generation target block size (perf review: ~4 MiB on v6e/v7x)."""
    try:
        kind = jax.devices()[0].device_kind.lower()
    except Exception:
        return 2 << 20
    if "v5 lite" in kind or "v5e" in kind or "v5litepod" in kind:
        return 2 << 20  # v5e: 1-2 MiB blocks already sit at the roofline knee.
    return 4 << 20      # v6e / v7x (and anything newer/unknown).


def _single_pass_footprint(row_tile, hw, itemsize):
    """Approx VMEM working set of one single-pass block: double-buffered in/out
    blocks plus ~4 block-sized f32 temporaries inside the kernel."""
    blk_io = row_tile * hw * itemsize
    blk_f32 = row_tile * hw * 4
    return 2 * 2 * blk_io + 4 * blk_f32


def _vmem_limit(footprint_bytes):
    """Scoped-VMEM limit derived from the actual footprint, clamped to a range
    that is safe on all generations (v7x physical VMEM is 64 MiB)."""
    return int(min(max(footprint_bytes + (2 << 20), 16 << 20), 48 << 20))


def _choose_row_tile(bc, hw, itemsize, target_bytes):
    """Row tile for the single-pass NCHW kernel.

    Sublane-aligned, ~target_bytes per block, capped so the whole working set
    fits the VMEM tiling budget, and sized so the grid is >= 2 and even
    (v7x megacore keeps both TensorCores busy; harmless on 1-TC v5e/v6e).
    The grid uses pl.cdiv, so the last block may be ragged - no padding copy.
    """
    sub = _sublane_rows(itemsize)
    if bc <= sub:
        return bc  # single full-extent block (always a legal block shape)
    row_bytes = max(hw * itemsize, 1)
    cap_target = (target_bytes // row_bytes) // sub * sub
    cap_vmem = (_VMEM_TILING_BUDGET // (hw * (4 * itemsize + 16))) // sub * sub
    cap = max(sub, min(cap_target, cap_vmem))
    nblk = max(_cdiv(bc, cap), 2)
    if nblk % 2:
        nblk += 1
    row_tile = min(cap, _round_up(_cdiv(bc, nblk), sub))
    return max(row_tile, sub)


# --------------------------------------------------------------------------- #
# Kernels
# --------------------------------------------------------------------------- #
def _simam_kernel(x_ref, o_ref, *, inv_n, e_lambda):
    """Single-pass NCHW kernel: block = (row_tile, H*W), reduce over lanes."""
    x = x_ref[...].astype(jnp.float32)
    # Two-pass (mean, then squared deviations): matches the PyTorch reference.
    mean = jnp.mean(x, axis=-1, keepdims=True)
    d = x - mean
    d2 = d * d
    s = jnp.sum(d2, axis=-1, keepdims=True)
    # sigmoid(d2/(4*(s/n+l)) + 0.5) == 0.5*tanh(d2/(8*(s/n+l)) + 0.25) + 0.5
    # (the 1/2 of the tanh identity is folded into the per-row reciprocal).
    inv = pl.reciprocal(8.0 * (s * inv_n + e_lambda), approx=False)
    t = jnp.tanh(d2 * inv + 0.25)
    o_ref[...] = (x * (0.5 * t + 0.5)).astype(o_ref.dtype)


def _simam_cl_kernel(x_ref, o_ref, *, inv_n, e_lambda):
    """Channels-last kernel: block = (1, H*W, c_tile), reduce over sublanes."""
    x = x_ref[...].astype(jnp.float32)
    mean = jnp.mean(x, axis=1, keepdims=True)
    d = x - mean
    d2 = d * d
    s = jnp.sum(d2, axis=1, keepdims=True)
    inv = pl.reciprocal(8.0 * (s * inv_n + e_lambda), approx=False)
    t = jnp.tanh(d2 * inv + 0.25)
    o_ref[...] = (x * (0.5 * t + 0.5)).astype(o_ref.dtype)


def _simam_stats_kernel(x_ref, mean_ref, s_ref, *, hw, hw_tile):
    """Pass 1 of the large-H*W path: accumulate per-row sum / sum-of-squares
    over spatial chunks (f32), finalize to (mean, sum((x-mu)^2)) on the last
    chunk.  Output blocks are resident across the reduction axis."""
    k = pl.program_id(1)

    @pl.when(k == 0)
    def _():
        mean_ref[...] = jnp.zeros_like(mean_ref)
        s_ref[...] = jnp.zeros_like(s_ref)

    x = x_ref[...].astype(jnp.float32)
    # Ragged last chunk: mask OOB lanes so they do not pollute the sums.
    idx = k * hw_tile + lax.broadcasted_iota(jnp.int32, x.shape, 1)
    x = jnp.where(idx < hw, x, 0.0)
    mean_ref[...] += jnp.sum(x, axis=-1, keepdims=True)       # raw sum
    s_ref[...] += jnp.sum(x * x, axis=-1, keepdims=True)      # raw sum of squares

    @pl.when(k == pl.num_programs(1) - 1)
    def _():
        total = mean_ref[...]
        mu = total * (1.0 / hw)
        # sum((x-mu)^2) == sum(x^2) - (sum(x))^2 / N, accumulated in f32.
        s_ref[...] = s_ref[...] - total * mu
        mean_ref[...] = mu


def _simam_apply_kernel(x_ref, mean_ref, s_ref, o_ref, *, inv_n, e_lambda):
    """Pass 2 of the large-H*W path: re-stream x and apply the gate."""
    x = x_ref[...].astype(jnp.float32)
    d = x - mean_ref[...]
    d2 = d * d
    inv = pl.reciprocal(8.0 * (s_ref[...] * inv_n + e_lambda), approx=False)
    t = jnp.tanh(d2 * inv + 0.25)
    o_ref[...] = (x * (0.5 * t + 0.5)).astype(o_ref.dtype)


# --------------------------------------------------------------------------- #
# Wrappers
# --------------------------------------------------------------------------- #
def _simam_single_pass(x2d, *, inv_n, e_lambda, target_block_bytes):
    bc, hw = x2d.shape
    itemsize = jnp.dtype(x2d.dtype).itemsize
    row_tile = _choose_row_tile(bc, hw, itemsize, target_block_bytes)
    grid = (_cdiv(bc, row_tile),)
    vmem_limit = _vmem_limit(_single_pass_footprint(row_tile, hw, itemsize))
    kernel = functools.partial(_simam_kernel, inv_n=inv_n, e_lambda=e_lambda)
    return pl.pallas_call(
        kernel,
        out_shape=jax.ShapeDtypeStruct((bc, hw), x2d.dtype),
        grid_spec=pltpu.PrefetchScalarGridSpec(
            num_scalar_prefetch=0,
            grid=grid,
            in_specs=[pl.BlockSpec((row_tile, hw), lambda i: (i, 0))],
            out_specs=pl.BlockSpec((row_tile, hw), lambda i: (i, 0)),
        ),
        compiler_params=pltpu.CompilerParams(
            dimension_semantics=("parallel",),
            vmem_limit_bytes=vmem_limit,
        ),
    )(x2d)


def _simam_spatial_chunked(x2d, *, inv_n, e_lambda, target_block_bytes):
    """Two-kernel path for very large H*W: 3 HBM passes of x instead of 2,
    but the spatial axis is streamed in ~128-lane-multiple chunks so VMEM
    never overflows regardless of H*W."""
    bc, hw = x2d.shape
    itemsize = jnp.dtype(x2d.dtype).itemsize
    sub = _sublane_rows(itemsize)

    row_tile = min(sub, bc)
    tgt = min(target_block_bytes, 2 << 20)
    hw_tile = max(128, (tgt // max(row_tile * itemsize, 1)) // 128 * 128)
    hw_tile = min(hw_tile, _round_up(hw, 128))
    rb = _cdiv(bc, row_tile)
    kb = _cdiv(hw, hw_tile)

    blk_io = row_tile * hw_tile * itemsize
    blk_f32 = row_tile * hw_tile * 4

    stats_kernel = functools.partial(_simam_stats_kernel, hw=hw, hw_tile=hw_tile)
    mean2d, s2d = pl.pallas_call(
        stats_kernel,
        out_shape=(jax.ShapeDtypeStruct((bc, 1), jnp.float32),
                   jax.ShapeDtypeStruct((bc, 1), jnp.float32)),
        grid_spec=pltpu.PrefetchScalarGridSpec(
            num_scalar_prefetch=0,
            grid=(rb, kb),
            in_specs=[pl.BlockSpec((row_tile, hw_tile), lambda i, k: (i, k))],
            out_specs=(pl.BlockSpec((row_tile, 1), lambda i, k: (i, 0)),
                       pl.BlockSpec((row_tile, 1), lambda i, k: (i, 0))),
        ),
        compiler_params=pltpu.CompilerParams(
            dimension_semantics=("parallel", "arbitrary"),
            vmem_limit_bytes=_vmem_limit(2 * blk_io + 3 * blk_f32),
        ),
    )(x2d)

    apply_kernel = functools.partial(_simam_apply_kernel,
                                     inv_n=inv_n, e_lambda=e_lambda)
    return pl.pallas_call(
        apply_kernel,
        out_shape=jax.ShapeDtypeStruct((bc, hw), x2d.dtype),
        grid_spec=pltpu.PrefetchScalarGridSpec(
            num_scalar_prefetch=0,
            grid=(rb, kb),
            in_specs=[pl.BlockSpec((row_tile, hw_tile), lambda i, k: (i, k)),
                      pl.BlockSpec((row_tile, 1), lambda i, k: (i, 0)),
                      pl.BlockSpec((row_tile, 1), lambda i, k: (i, 0))],
            out_specs=pl.BlockSpec((row_tile, hw_tile), lambda i, k: (i, k)),
        ),
        compiler_params=pltpu.CompilerParams(
            dimension_semantics=("parallel", "parallel"),
            vmem_limit_bytes=_vmem_limit(4 * blk_io + 3 * blk_f32),
        ),
    )(x2d, mean2d, s2d)


def simam(x, e_lambda=1e-4, *, target_block_bytes=None,
          _force_spatial_chunked=False):
    """SimAM forward for NCHW input (B, C, H, W).  Returns same shape/dtype.

    Note: H = W = 1 maps divide by zero (n = 0) exactly like the PyTorch
    reference; callers should not use SimAM on 1x1 feature maps.
    """
    b, c, h, w = x.shape
    hw = h * w
    bc = b * c
    n = float(hw - 1)
    inv_n = (1.0 / n) if n > 0.0 else float("inf")
    itemsize = jnp.dtype(x.dtype).itemsize
    if target_block_bytes is None:
        target_block_bytes = _default_block_bytes()

    x2d = x.reshape(bc, hw)
    sub = _sublane_rows(itemsize)

    if (_force_spatial_chunked
            or _single_pass_footprint(sub, hw, itemsize) > _VMEM_TILING_BUDGET):
        out2d = _simam_spatial_chunked(
            x2d, inv_n=inv_n, e_lambda=e_lambda,
            target_block_bytes=target_block_bytes)
    else:
        out2d = _simam_single_pass(
            x2d, inv_n=inv_n, e_lambda=e_lambda,
            target_block_bytes=target_block_bytes)
    return out2d.reshape(b, c, h, w)


def simam_channels_last(x, e_lambda=1e-4, *, target_block_bytes=None):
    """SimAM forward for NHWC input (B, H, W, C).  Returns NHWC.

    Channels sit on the 128-wide lane axis, so 7x7 / 14x14 / 28x28 maps stay
    lane-dense (full-width vector stores, no masked vst), which the NCHW
    layout cannot achieve when H*W is not a multiple of 128.  Intended for
    callers whose data is already channels-last (or who can fuse the layout
    change upstream).  Assumes one (H*W, c_tile) spatial slab fits in VMEM,
    which holds for typical classification-backbone map sizes.
    """
    b, h, w, c = x.shape
    hw = h * w
    n = float(hw - 1)
    inv_n = (1.0 / n) if n > 0.0 else float("inf")
    itemsize = jnp.dtype(x.dtype).itemsize
    if target_block_bytes is None:
        target_block_bytes = _default_block_bytes()

    x3d = x.reshape(b, hw, c)
    if c <= 128 or c % 128 != 0:
        c_tile = c  # full-extent lane block is always legal
    else:
        cap = max(128, (target_block_bytes // max(hw * itemsize, 1)) // 128 * 128)
        c_tile = min(c, cap)
    grid = (b, _cdiv(c, c_tile))

    blk_io = hw * c_tile * itemsize
    blk_f32 = hw * c_tile * 4
    kernel = functools.partial(_simam_cl_kernel, inv_n=inv_n, e_lambda=e_lambda)
    out3d = pl.pallas_call(
        kernel,
        out_shape=jax.ShapeDtypeStruct((b, hw, c), x.dtype),
        grid_spec=pltpu.PrefetchScalarGridSpec(
            num_scalar_prefetch=0,
            grid=grid,
            in_specs=[pl.BlockSpec((1, hw, c_tile), lambda bi, cj: (bi, 0, cj))],
            out_specs=pl.BlockSpec((1, hw, c_tile), lambda bi, cj: (bi, 0, cj)),
        ),
        compiler_params=pltpu.CompilerParams(
            dimension_semantics=("parallel", "parallel"),
            vmem_limit_bytes=_vmem_limit(2 * 2 * blk_io + 4 * blk_f32),
        ),
    )(x3d)
    return out3d.reshape(b, h, w, c)


# --------------------------------------------------------------------------- #
# Pure-JAX reference (mirrors the PyTorch forward) and self-test
# --------------------------------------------------------------------------- #
def _simam_ref(x, e_lambda=1e-4):
    b, c, h, w = x.shape
    n = w * h - 1
    mu = jnp.mean(x, axis=(2, 3), keepdims=True)
    d2 = (x - mu) ** 2
    y = d2 / (4.0 * (jnp.sum(d2, axis=(2, 3), keepdims=True) / n + e_lambda)) + 0.5
    return x * jax.nn.sigmoid(y)


if __name__ == "__main__":
    key = jax.random.PRNGKey(0)
    k1, k2, k3, k4 = jax.random.split(key, 4)

    # 1) NCHW main path, H*W a multiple of 128 (lane-dense).
    x1 = jax.random.normal(k1, (2, 4, 16, 16), dtype=jnp.float32)
    out1 = jax.block_until_ready(simam(x1, e_lambda=1e-4))
    ref1 = _simam_ref(x1, e_lambda=1e-4)
    assert out1.shape == x1.shape and out1.dtype == x1.dtype
    assert jnp.allclose(out1, ref1, atol=1e-5, rtol=1e-5), (
        f"NCHW path max abs err {jnp.max(jnp.abs(out1 - ref1))}")

    # 2) NCHW path with H*W = 49 (full-extent lane block, not 128-aligned).
    x2 = jax.random.normal(k2, (2, 4, 7, 7), dtype=jnp.float32)
    out2 = jax.block_until_ready(simam(x2))
    ref2 = _simam_ref(x2)
    assert jnp.allclose(out2, ref2, atol=1e-5, rtol=1e-5), (
        f"NCHW 7x7 path max abs err {jnp.max(jnp.abs(out2 - ref2))}")

    # 3) Channels-last (NHWC) lane-dense path.
    x3 = jax.random.normal(k3, (2, 7, 7, 128), dtype=jnp.float32)
    out3 = jax.block_until_ready(simam_channels_last(x3))
    ref3 = jnp.transpose(_simam_ref(jnp.transpose(x3, (0, 3, 1, 2))), (0, 2, 3, 1))
    assert out3.shape == x3.shape and out3.dtype == x3.dtype
    assert jnp.allclose(out3, ref3, atol=1e-5, rtol=1e-5), (
        f"NHWC path max abs err {jnp.max(jnp.abs(out3 - ref3))}")

    # 4) Spatial-chunked large-H*W path (forced with tiny blocks so the
    #    reduction grid axis and the ragged-tail lane masking are exercised).
    x4 = jax.random.normal(k4, (2, 4, 20, 20), dtype=jnp.float32)
    out4 = jax.block_until_ready(
        simam(x4, target_block_bytes=4096, _force_spatial_chunked=True))
    ref4 = _simam_ref(x4)
    assert jnp.allclose(out4, ref4, atol=1e-5, rtol=1e-5), (
        f"chunked path max abs err {jnp.max(jnp.abs(out4 - ref4))}")

    print("KERNEL_OK")
</pallas_src>

<mosaic_0001>
module attributes {stable_mosaic.version = 11 : i64} {
  func.func @_simam_kernel(%arg0: i32, %arg1: memref<8x256xf32, #tpu.memory_space<vmem>>, %arg2: memref<8x256xf32, #tpu.memory_space<vmem>>) attributes {dimension_semantics = [#tpu.dimension_semantics<parallel>], iteration_bounds = array<i64: 1>, scalar_prefetch = 0 : i64, scratch_operands = 0 : i64, tpu.core_type = #tpu.core_type<tc>, window_params = [{transform_indices = @transform_0, window_bounds = array<i64: 8, 256>}, {transform_indices = @transform_1, window_bounds = array<i64: 8, 256>}]} {
    %c0 = arith.constant 0 : index
    %c0_0 = arith.constant 0 : index
    %0 = vector.load %arg1[%c0, %c0_0] : memref<8x256xf32, #tpu.memory_space<vmem>>, vector<8x256xf32>
    %cst = arith.constant dense<0.000000e+00> : vector<8xf32>
    %1 = vector.multi_reduction <add>, %0, %cst [1] : vector<8x256xf32> to vector<8xf32>
    %2 = vector.shape_cast %1 : vector<8xf32> to vector<8x1xf32>
    %cst_1 = arith.constant 2.560000e+02 : f32
    %3 = vector.broadcast %cst_1 : f32 to vector<8x1xf32>
    %4 = arith.divf %2, %3 : vector<8x1xf32>
    %5 = vector.broadcast %4 : vector<8x1xf32> to vector<8x256xf32>
    %6 = arith.subf %0, %5 : vector<8x256xf32>
    %7 = arith.mulf %6, %6 : vector<8x256xf32>
    %cst_2 = arith.constant dense<0.000000e+00> : vector<8xf32>
    %8 = vector.multi_reduction <add>, %7, %cst_2 [1] : vector<8x256xf32> to vector<8xf32>
    %9 = vector.shape_cast %8 : vector<8xf32> to vector<8x1xf32>
    %cst_3 = arith.constant 0.00392156886 : f32
    %10 = vector.broadcast %cst_3 : f32 to vector<8x1xf32>
    %11 = arith.mulf %9, %10 : vector<8x1xf32>
    %cst_4 = arith.constant 9.99999974E-5 : f32
    %12 = vector.broadcast %cst_4 : f32 to vector<8x1xf32>
    %13 = arith.addf %11, %12 : vector<8x1xf32>
    %cst_5 = arith.constant 8.000000e+00 : f32
    %14 = vector.broadcast %cst_5 : f32 to vector<8x1xf32>
    %15 = arith.mulf %14, %13 : vector<8x1xf32>
    %16 = tpu.reciprocal %15 : vector<8x1xf32> -> vector<8x1xf32>
    %17 = vector.broadcast %16 : vector<8x1xf32> to vector<8x256xf32>
    %18 = arith.mulf %7, %17 : vector<8x256xf32>
    %cst_6 = arith.constant 2.500000e-01 : f32
    %19 = vector.broadcast %cst_6 : f32 to vector<8x256xf32>
    %20 = arith.addf %18, %19 : vector<8x256xf32>
    %21 = math.tanh %20 : vector<8x256xf32>
    %cst_7 = arith.constant 5.000000e-01 : f32
    %22 = vector.broadcast %cst_7 : f32 to vector<8x256xf32>
    %23 = arith.mulf %22, %21 : vector<8x256xf32>
    %cst_8 = arith.constant 5.000000e-01 : f32
    %24 = vector.broadcast %cst_8 : f32 to vector<8x256xf32>
    %25 = arith.addf %23, %24 : vector<8x256xf32>
    %26 = arith.mulf %0, %25 : vector<8x256xf32>
    %c0_9 = arith.constant 0 : index
    %c0_10 = arith.constant 0 : index
    %27 = vector.load %arg2[%c0_9, %c0_10] : memref<8x256xf32, #tpu.memory_space<vmem>>, vector<8x256xf32>
    tpu.vector_store %arg2[%c0_9, %c0_10], %26 {strides = array<i32>} : memref<8x256xf32, #tpu.memory_space<vmem>>, vector<8x256xf32>,
    return
  }
  func.func @transform_0(%arg0: i32) -> (i32, i32) {
    %c0_i32 = arith.constant 0 : i32
    %c0_i32_0 = arith.constant 0 : i32
    return %arg0, %c0_i32 : i32, i32
  }
  func.func @transform_1(%arg0: i32) -> (i32, i32) {
    %c0_i32 = arith.constant 0 : i32
    %c0_i32_0 = arith.constant 0 : i32
    return %arg0, %c0_i32 : i32, i32
  }
}

</mosaic_0001>

<bundles_post_ra>
// kernel: tpu_custom_call.1
= control target key start
LH: loop header
LB: loop body
LE: loop exit
PB: predicated region body
PF: predicated region fallthrough
CT: control target
= control target key end

     0   :  { %6 = vsyncpa [#allocation3], 0  ;;  %s173_s0 = inlined_call_operand.hbm [shape: f32[8,256], index: 0, kind: input, shape index: {}]   ;;  %s174_s1 = inlined_call_operand.hbm [shape: f32[8,256], index: 1, kind: output, shape index: {}]  }
   0x1   :  { %7 = vsyncpa [#allocation4], 0  ;;  %s13_s8 = sshll.u32 %s173_s0, 4  ;;  %s154_s9 = smov [#allocation2]   ;;  %s14_s8 = int_to_ptr.hbm [resolvable:$true] %s13_s8 }
   0x2   :  { %s15_s10 = sshll.u32 %s154_s9, 4  ;;  %s16_s10 = int_to_ptr.vmem [resolvable:$true] %s15_s10 }
   0x3   :  { %18 = dma.hbm_to_vmem [thread:$0]  %s14_s8, 256, %s16_s10, [#allocation3]  }
   0x4   :  { %150 = dma.done.wait [#allocation3], 256  }
   0x5   :  { %151 = vsyncadd [#allocation3], 4294967040  ;;  %v23_v0 = vld [vmem:[#allocation2] sm:$0xff]  ;;  %v24_v1 = vld [vmem:[#allocation2 + $0x8] sm:$0xff]  ;;  %v155_v3 = vmov 256.0   ;;  %s156_s0 = smov [#allocation5]  }
   0x6   :  { %v25_v2 = vadd.f32 %v24_v1, %v23_v0  ;;  %94 = vrcp.f32 %v155_v3  ;;  %s79_s11 = sshll.u32 %s156_s0, 4  ;;  %s81_s14 = sshll.u32 %s174_s1, 4  ;;  %s80_s11 = int_to_ptr.vmem [resolvable:$true] %s79_s11  ;;  %s82_s14 = int_to_ptr.hbm [resolvable:$true] %s81_s14 }
   0x8   :  { %26 = vadd.xlane.f32.xlu0 %v25_v2 }
   0xc   :  { %v95_v4 = vpop.eup %94 }
   0xd   :  { %v29_v5 = vmul.f32 256.0, %v95_v4  ;;  %vm33_vm0 = vweird.f32 %v95_v4 }
   0xf   :  { %v30_v6 = vsub.f32 1.0, %v29_v5 }
  0x11   :  { %v31_v7 = vmul.f32 %v95_v4, %v30_v6 }
  0x13   :  { %v32_v8 = vadd.f32 %v95_v4, %v31_v7 }
  0x15   :  { %v34_v9 = vsel %vm33_vm0, %v95_v4, %v32_v8 }
  0x7b   :  { %v27_v10 = vpop.xlane.xlu0 %26 }
  0x7c   :  { %v35_v11 = vmul.f32 %v34_v9, %v27_v10 }
  0x7e   :  { %v36_v12 = vsub.f32 %v23_v0, %v35_v11  ;;  %v37_v13 = vsub.f32 %v24_v1, %v35_v11 }
  0x80   :  { %v38_v14 = vmul.f32 %v36_v12, %v36_v12  ;;  %v39_v15 = vmul.f32 %v37_v13, %v37_v13 }
  0x82   :  { %v40_v16 = vadd.f32 %v39_v15, %v38_v14 }
  0x84   :  { %41 = vadd.xlane.f32.xlu0 %v40_v16 }
  0xf7   :  { %v42_v17 = vpop.xlane.xlu0 %41 }
  0xf8   :  { %v43_v18 = vmul.f32 0.003921569, %v42_v17 }
  0xfa   :  { %v44_v19 = vadd.f32 0.0001, %v43_v18 }
  0xfc   :  { %v45_v20 = vmul.f32 8.0, %v44_v19 }
  0xfe   :  { %96 = vrcp.f32 %v45_v20  ;;  %v57_v24 = vand.u32 2147483648, %v45_v20  ;;  %v55_v26 = vand.u32 2147483647, %v45_v20  ;;  %vm51_vm2 = vweird.f32 %v45_v20 }
 0x100   :  { %v58_v28 = vor.u32 1.1754944e-38, %v57_v24  ;;  %vm56_vm4 = vcmp.eq.f32.partialorder %v55_v26, 8.507059e+37 }
 0x104   :  { %v97_v21 = vpop.eup %96 }
 0x105   :  { %v47_v22 = vmul.f32 %v97_v21, %v45_v20  ;;  %vm52_vm1 = vweird.f32 %v97_v21 }
 0x106   :  { %vm53_vm3 = vmor %vm51_vm2, %vm52_vm1 }
 0x107   :  { %v48_v23 = vsub.f32 1.0, %v47_v22 }
 0x109   :  { %v49_v25 = vmul.f32 %v97_v21, %v48_v23 }
 0x10b   :  { %v50_v27 = vadd.f32 %v97_v21, %v49_v25 }
 0x10d   :  { %v54_v29 = vsel %vm53_vm3, %v97_v21, %v50_v27 }
 0x10e   :  { %v59_v30 = vsel %vm56_vm4, %v58_v28, %v54_v29 }
 0x10f   :  { %v60_v31 = vmul.f32 %v59_v30, %v38_v14  ;;  %v61_v32 = vmul.f32 %v59_v30, %v39_v15 }
 0x111   :  { %v62_v33 = vadd.f32 0.25, %v60_v31  ;;  %v63_v34 = vadd.f32 0.25, %v61_v32 }
 0x113   :  { %98 = vtanh.f32 %v62_v33 }
 0x114   :  { %100 = vtanh.f32 %v63_v34 }
 0x119   :  { %v99_v35 = vpop.eup %98 }
 0x11a   :  { %v101_v36 = vpop.eup %100  ;;  %v66_v37 = vmul.f32 0.5, %v99_v35 }
 0x11b   :  { %v67_v38 = vmul.f32 0.5, %v101_v36 }
 0x11c   :  { %v68_v39 = vadd.f32 0.5, %v66_v37 }
 0x11d   :  { %v69_v40 = vadd.f32 0.5, %v67_v38 }
 0x11e   :  { %v70_v41 = vmul.f32 %v68_v39, %v23_v0 }
 0x11f   :  { %v71_v42 = vmul.f32 %v69_v40, %v24_v1 }
 0x120   :  { %72 = vst [vmem:[#allocation5] sm:$0xff] %v70_v41 }
 0x121   :  { %73 = vst [vmem:[#allocation5 + $0x8] sm:$0xff] %v71_v42 }
 0x122   :  { %84 = dma.vmem_to_hbm [thread:$0]  %s80_s11, 256, %s82_s14, [#allocation4]  }
 0x123   :  { %152 = dma.done.wait [#allocation4], 256  }
 0x124   :  { %153 = vsyncadd [#allocation4], 4294967040 }
 0x125   :  { %89 = vsyncpa [#allocation3], 1 }
 0x126   :  { %90 = vsyncpa [#allocation4], 1 }

</bundles_post_ra>
